<compile_context>
chip_gen: v5e
topology: v5e:2x2
jax: 0.10.0
libtpu: 0.0.40
codegen_flags: <defaults>
</compile_context>

<pallas_src>
import jax
import jax.numpy as jnp
from jax.experimental import pallas as pl
from jax.experimental.pallas import tpu as pltpu


def _vmem_capacity_bytes():
    try:
        return pltpu.get_tpu_info().vmem_capacity_bytes
    except Exception:
        return 64 * 1024 * 1024  # conservative (v7x per-TC physical VMEM)


def _pick_tile(n, granule, cap):
    """Largest d <= cap that is a multiple of `granule` and divides n; else n."""
    d = min(cap, n)
    d -= d % granule
    while d >= granule:
        if n % d == 0:
            return d
        d -= granule
    return n  # full dim is always a legal block size


def ale_kernel(x_ref, w_ref, b_ref, out_ref, acc_ref):
    # x_ref: (TB, TT, D)  w_ref: (D, Cpad)  b_ref: (1, Cpad)
    # out_ref: (TB, Cpad) acc_ref: (TB, D) f32 scratch
    t = pl.program_id(1)

    @pl.when(t == 0)
    def _():
        acc_ref[...] = jnp.zeros_like(acc_ref)

    # Accumulate the T-sum for this tile (upcast per-tile; f32 accumulation).
    acc_ref[...] += jnp.sum(x_ref[...].astype(jnp.float32), axis=1)

    @pl.when(t == pl.num_programs(1) - 1)
    def _():
        # 1/T is folded into w_ref (NOT into b_ref) by the wrapper, so the
        # accumulated sum is the correct LHS here.
        logits = (
            jnp.dot(acc_ref[...], w_ref[...], preferred_element_type=jnp.float32)
            + b_ref[...]
        )
        # Numerically stable softmax over the (padded) class axis; padded
        # classes carry a -1e30 bias so their exp underflows to exactly 0.
        m = jnp.max(logits, axis=1, keepdims=True)
        e = jnp.exp(logits - m)
        denom = jnp.sum(e, axis=1, keepdims=True)
        # exact reciprocal keeps the 1e-5 tolerance; switch to approx=True (+1
        # Newton step) only if C grows into the 1000s.
        out_ref[...] = (e * pl.reciprocal(denom, approx=False)).astype(out_ref.dtype)


def layer_ale_forward(x, fc_weight, fc_bias, attribute, *, tb=None, tt=None):
    """x: [B,T,D], fc_weight: [A,D], fc_bias: [A], attribute: [A,C] -> [B,C]."""
    B, T, D = x.shape
    C = attribute.shape[1]

    # Fold the two static linear maps and the 1/T of the mean into one map:
    #   softmax( mean_T(x) @ fc_w.T @ attr + fc_b @ attr )
    # = softmax( sum_T(x) @ (fc_w.T @ attr / T) + (fc_b @ attr) )
    w_comb = (fc_weight.T.astype(jnp.float32) @ attribute.astype(jnp.float32)) / T
    b_comb = (fc_bias.astype(jnp.float32) @ attribute.astype(jnp.float32)).reshape(1, C)

    # Pad class dim to a lane-dense multiple of 128 (unmasked output stores).
    c_pad = max(128, pl.cdiv(C, 128) * 128)
    if c_pad != C:
        w_comb = jnp.pad(w_comb, ((0, 0), (0, c_pad - C)))
        b_comb = jnp.pad(b_comb, ((0, 0), (0, c_pad - C)), constant_values=-1e30)

    # Tile sizes sized against VMEM (double-buffered x tile is the big item).
    vmem_cap = _vmem_capacity_bytes()
    x_tile_budget = min(8 * 1024 * 1024, vmem_cap // 8)  # per x tile (x2 dbl-buffer)
    if tb is None:
        tb = _pick_tile(B, 8, 1024)  # sublane dim of the output block
    if tt is None:
        cap_tt = max(8, x_tile_budget // max(1, tb * D * x.dtype.itemsize))
        tt = _pick_tile(T, 8, cap_tt)

    grid = (B // tb, T // tt)

    out_padded = pl.pallas_call(
        ale_kernel,
        out_shape=jax.ShapeDtypeStruct((B, c_pad), jnp.float32),
        grid_spec=pltpu.PrefetchScalarGridSpec(
            num_scalar_prefetch=0,
            grid=grid,
            in_specs=[
                pl.BlockSpec((tb, tt, D), lambda b, t: (b, t, 0)),
                pl.BlockSpec((D, c_pad), lambda b, t: (0, 0)),
                pl.BlockSpec((1, c_pad), lambda b, t: (0, 0)),
            ],
            out_specs=pl.BlockSpec((tb, c_pad), lambda b, t: (b, 0)),
            scratch_shapes=[pltpu.VMEM((tb, D), jnp.float32)],
        ),
        compiler_params=pltpu.CompilerParams(
            dimension_semantics=("parallel", "arbitrary"),
            vmem_limit_bytes=int(min(96 * 1024 * 1024, vmem_cap * 3 // 4)),
        ),
    )(x, w_comb, b_comb)

    return out_padded[:, :C]


if __name__ == "__main__":
    # Small shapes consistent with the forward:
    #   batch=2, seq(T)=16, input_dim=32, attri_dim=16, num_classes=8
    B, T, D, A, C = 2, 16, 32, 16, 8

    key = jax.random.PRNGKey(0)
    kx, kw, kb, ka = jax.random.split(key, 4)

    x = jax.random.normal(kx, (B, T, D), dtype=jnp.float32)
    fc_weight = jax.random.normal(kw, (A, D), dtype=jnp.float32) * 0.1
    fc_bias = jax.random.normal(kb, (A,), dtype=jnp.float32) * 0.1
    attribute = jax.random.normal(ka, (A, C), dtype=jnp.float32)

    # jit the whole wrapper so the w_comb/b_comb fold fuses into one program
    # (no extra eager dispatches per call).  tt=8 forces a 2-tile T reduction
    # so the accumulate-then-epilogue path is exercised even at toy shapes.
    fwd = jax.jit(layer_ale_forward, static_argnames=("tb", "tt"))
    out = fwd(x, fc_weight, fc_bias, attribute, tt=8)
    out = jax.block_until_ready(out)

    # Reference: exact (unfused) PyTorch-order computation in plain JAX.
    xm = jnp.mean(x, axis=1)
    mid = xm @ fc_weight.T + fc_bias
    ref = jax.nn.softmax(mid @ attribute, axis=1)

    assert out.shape == (B, C)
    assert jnp.allclose(out, ref, atol=1e-5, rtol=1e-5)
    assert jnp.allclose(jnp.sum(out, axis=1), 1.0, atol=1e-5)

    print("KERNEL_OK")
</pallas_src>

<mosaic_0001>
module attributes {stable_mosaic.version = 11 : i64} {
  func.func @ale_kernel(%arg0: i32, %arg1: i32, %arg2: memref<2x8x32xf32, #tpu.memory_space<vmem>>, %arg3: memref<32x128xf32, #tpu.memory_space<vmem>>, %arg4: memref<1x128xf32, #tpu.memory_space<vmem>>, %arg5: memref<2x128xf32, #tpu.memory_space<vmem>>, %arg6: memref<2x32xf32, #tpu.memory_space<vmem>>) attributes {dimension_semantics = [#tpu.dimension_semantics<parallel>, #tpu.dimension_semantics<arbitrary>], iteration_bounds = array<i64: 1, 2>, scalar_prefetch = 0 : i64, scratch_operands = 1 : i64, tpu.core_type = #tpu.core_type<tc>, window_params = [{transform_indices = @transform_0, window_bounds = array<i64: 2, 8, 32>}, {pipeline_mode = #tpu.pipeline_mode<synchronous>, transform_indices = @transform_1, window_bounds = array<i64: 32, 128>}, {pipeline_mode = #tpu.pipeline_mode<synchronous>, transform_indices = @transform_2, window_bounds = array<i64: 1, 128>}, {transform_indices = @transform_3, window_bounds = array<i64: 2, 128>}]} {
    %c0_i32 = arith.constant 0 : i32
    %0 = arith.cmpi eq, %arg1, %c0_i32 : i32
    %1 = arith.extui %0 : i1 to i32
    %c0_i32_0 = arith.constant 0 : i32
    %2 = arith.cmpi ne, %1, %c0_i32_0 : i32
    scf.if %2 {
      %cst_8 = arith.constant 0.000000e+00 : f32
      %11 = vector.broadcast %cst_8 : f32 to vector<2x32xf32>
      %c0_9 = arith.constant 0 : index
      %c0_10 = arith.constant 0 : index
      %12 = vector.load %arg6[%c0_9, %c0_10] : memref<2x32xf32, #tpu.memory_space<vmem>>, vector<2x32xf32>
      tpu.vector_store %arg6[%c0_9, %c0_10], %11 {strides = array<i32>} : memref<2x32xf32, #tpu.memory_space<vmem>>, vector<2x32xf32>,
    } else {
    }
    %c0 = arith.constant 0 : index
    %c0_1 = arith.constant 0 : index
    %3 = vector.load %arg6[%c0, %c0_1] : memref<2x32xf32, #tpu.memory_space<vmem>>, vector<2x32xf32>
    %c0_2 = arith.constant 0 : index
    %c0_3 = arith.constant 0 : index
    %c0_4 = arith.constant 0 : index
    %4 = vector.load %arg2[%c0_2, %c0_3, %c0_4] : memref<2x8x32xf32, #tpu.memory_space<vmem>>, vector<2x8x32xf32>
    %cst = arith.constant dense<0.000000e+00> : vector<2x32xf32>
    %5 = vector.multi_reduction <add>, %4, %cst [1] : vector<2x8x32xf32> to vector<2x32xf32>
    %6 = arith.addf %3, %5 : vector<2x32xf32>
    %c0_5 = arith.constant 0 : index
    %c0_6 = arith.constant 0 : index
    %7 = vector.load %arg6[%c0_5, %c0_6] : memref<2x32xf32, #tpu.memory_space<vmem>>, vector<2x32xf32>
    tpu.vector_store %arg6[%c0_5, %c0_6], %6 {strides = array<i32>} : memref<2x32xf32, #tpu.memory_space<vmem>>, vector<2x32xf32>,
    %c1_i32 = arith.constant 1 : i32
    %8 = arith.cmpi eq, %arg1, %c1_i32 : i32
    %9 = arith.extui %8 : i1 to i32
    %c0_i32_7 = arith.constant 0 : i32
    %10 = arith.cmpi ne, %9, %c0_i32_7 : i32
    scf.if %10 {
      %c0_8 = arith.constant 0 : index
      %c0_9 = arith.constant 0 : index
      %11 = vector.load %arg6[%c0_8, %c0_9] : memref<2x32xf32, #tpu.memory_space<vmem>>, vector<2x32xf32>
      %c0_10 = arith.constant 0 : index
      %c0_11 = arith.constant 0 : index
      %12 = vector.load %arg3[%c0_10, %c0_11] : memref<32x128xf32, #tpu.memory_space<vmem>>, vector<32x128xf32>
      %cst_12 = arith.constant dense<0.000000e+00> : vector<2x128xf32>
      %13 = tpu.matmul %11, %12, %cst_12 {dimension_numbers = #tpu.dot_dimension_numbers<[1], [0], [0], [1], [0, 0, 1, 1], [], []>} : vector<2x32xf32>, vector<32x128xf32>, vector<2x128xf32> -> vector<2x128xf32>
      %c0_13 = arith.constant 0 : index
      %c0_14 = arith.constant 0 : index
      %14 = vector.load %arg4[%c0_13, %c0_14] : memref<1x128xf32, #tpu.memory_space<vmem>>, vector<1x128xf32>
      %15 = vector.broadcast %14 : vector<1x128xf32> to vector<2x128xf32>
      %16 = arith.addf %13, %15 : vector<2x128xf32>
      %cst_15 = arith.constant dense<0xFF800000> : vector<2xf32>
      %17 = vector.multi_reduction <maximumf>, %16, %cst_15 [1] : vector<2x128xf32> to vector<2xf32>
      %18 = vector.shape_cast %17 : vector<2xf32> to vector<2x1xf32>
      %19 = vector.broadcast %18 : vector<2x1xf32> to vector<2x128xf32>
      %20 = arith.subf %16, %19 : vector<2x128xf32>
      %21 = math.exp %20 : vector<2x128xf32>
      %cst_16 = arith.constant dense<0.000000e+00> : vector<2xf32>
      %22 = vector.multi_reduction <add>, %21, %cst_16 [1] : vector<2x128xf32> to vector<2xf32>
      %23 = vector.shape_cast %22 : vector<2xf32> to vector<2x1xf32>
      %24 = tpu.reciprocal %23 : vector<2x1xf32> -> vector<2x1xf32>
      %25 = vector.broadcast %24 : vector<2x1xf32> to vector<2x128xf32>
      %26 = arith.mulf %21, %25 : vector<2x128xf32>
      %c0_17 = arith.constant 0 : index
      %c0_18 = arith.constant 0 : index
      %27 = vector.load %arg5[%c0_17, %c0_18] : memref<2x128xf32, #tpu.memory_space<vmem>>, vector<2x128xf32>
      tpu.vector_store %arg5[%c0_17, %c0_18], %26 {strides = array<i32>} : memref<2x128xf32, #tpu.memory_space<vmem>>, vector<2x128xf32>,
    } else {
    }
    return
  }
  func.func @transform_0(%arg0: i32, %arg1: i32) -> (i32, i32, i32) {
    %c0_i32 = arith.constant 0 : i32
    %c0_i32_0 = arith.constant 0 : i32
    return %arg0, %arg1, %c0_i32 : i32, i32, i32
  }
  func.func @transform_1(%arg0: i32, %arg1: i32) -> (i32, i32) {
    %c0_i32 = arith.constant 0 : i32
    %c0_i32_0 = arith.constant 0 : i32
    %c0_i32_1 = arith.constant 0 : i32
    return %c0_i32, %c0_i32_0 : i32, i32
  }
  func.func @transform_2(%arg0: i32, %arg1: i32) -> (i32, i32) {
    %c0_i32 = arith.constant 0 : i32
    %c0_i32_0 = arith.constant 0 : i32
    %c0_i32_1 = arith.constant 0 : i32
    return %c0_i32, %c0_i32_0 : i32, i32
  }
  func.func @transform_3(%arg0: i32, %arg1: i32) -> (i32, i32) {
    %c0_i32 = arith.constant 0 : i32
    %c0_i32_0 = arith.constant 0 : i32
    return %arg0, %c0_i32 : i32, i32
  }
}

</mosaic_0001>

<bundles_post_ra>
// kernel: layer_ale_forward.1
= control target key start
LH: loop header
LB: loop body
LE: loop exit
PB: predicated region body
PF: predicated region fallthrough
CT: control target
= control target key end

     0   :  { %8 = vsyncpa [#allocation5], 0  ;;  %s543_s12 = smov 0   ;;  %s545_s13 = smov 0   ;;  %s630_s0 = inlined_call_operand.vmem [shape: f32[2,16,32], index: 0, kind: input, shape index: {}]   ;;  %s631_s1 = inlined_call_operand.vmem [shape: f32[32,128], index: 1, kind: input, shape index: {}]   ;;  %s632_s2 = inlined_call_operand.vmem [shape: f32[1,128], index: 2, kind: input, shape index: {}]   ;;  %s633_s3 = inlined_call_operand.hbm [shape: f32[2,128], index: 3, kind: output, shape index: {}]  }
   0x1   :  { %s547_s14 = smov 0   ;;  %s549_s15 = smov 0  }
   0x2   :  { %s551_s16 = smov 0  }
   0x3 LB: > { %s382_s17 = sadd.s32 4294967295, %s519_s16   ;;  %s23_s18 = sadd.s32 1, %s515_s15  ;;  %s519_s16 = sphi %s551_s16, %s14_s16   ;;  %s515_s15 = sphi %s549_s15, %s637_s15   ;;  %s511_s14 = sphi %s547_s14, %s636_s14   ;;  %s507_s13 = sphi %s545_s13, %s635_s13   ;;  %s503_s12 = sphi %s543_s12, %s634_s12  }
   0x4   : > { %p24_p0 = scmp.ge.s32.totalorder %s23_s18, 2  ;;  %p42_p1 = scmp.ne.s32.totalorder %s507_s13, %s503_s12 }
   0x5   : > { %p43_p2 = scmp.eq.s32.totalorder %s519_s16, 0  ;;  %s35_s20 = sadd.s32 1, %s507_s13 }
   0x6   : > { %s639_s18 = smov (%p24_p0, %s23_s18), 0  ;;  %p384_p5 = scmp.ge.s32.totalorder %s519_s16, 2 }
   0x7   : > { %p44_p3 = por %p43_p2, %p42_p1  ;;  %s31_s19 = ssub.s32 %s515_s15, %s639_s18 }
   0x8   : > { %p33_p4 = scmp.eq.s32.totalorder %s31_s19, 0  ;;  %142 = sbr.rel (%p384_p5) target bundleno = 19 (0x13), region = 24 }
   0xa   : > { %s579_s21 = scalar_select %p33_p4, %s507_s13, %s35_s20  }
   0xd   : > { %145 = sbr.rel (!%p44_p3) target bundleno = 19 (0x13), region = 28  ;;  %s147_s22 = sand.u32 (%p44_p3), 1, %s507_s13  }
   0xe   : > { %s386_s23 = sshll.u32 (%p44_p3), %s515_s15, 3  ;;  %s385_s24 = sshll.u32 (%p44_p3), %s147_s22, 4 }
   0xf   : > { %s154_s27 = scalar_lea.vmem (%p44_p3), %s630_s0, %s386_s23  ;;  %s149_s28 = scalar_lea.vmem (%p44_p3), [#allocation3], %s385_s24 }
  0x10   : > { %v185_v0 = vld [vmem:[%s154_s27] sm:$0xff] (%p44_p3)  ;;  %v187_v1 = vld [vmem:[%s154_s27 + $0x10] sm:$0xff] (%p44_p3) }
  0x11   : > { %186 = vst [vmem:[%s149_s28] sm:$0xff] (%p44_p3), %v185_v0 }
  0x12   : > { %188 = vst [vmem:[%s149_s28 + $0x8] sm:$0xff] %v187_v1 }
  0x13 PF: > { %p387_p6 = scmp.ge.s32.totalorder %s519_s16, 1  ;;  %p193_p7 = scmp.lt.s32.totalorder %s519_s16, 3 }
  0x15   : > { %p194_p8 = pnand %p387_p6, %p193_p7 }
  0x16   : > { %s200_s29 = sand.u32 (!%p194_p8), 1, %s503_s12   ;;  %p389_p9 = scmp.ne.s32.totalorder (!%p194_p8), %s511_s14, 0 }
  0x17   : > { %197 = sbr.rel (%p194_p8) target bundleno = 460 (0x1cc), region = 66  ;;  %s388_s30 = sshll.u32 (!%p194_p8), %s200_s29, 4 }
  0x18   : > { %s202_s4 = scalar_lea.vmem (!%p194_p8), [#allocation3], %s388_s30 }
  0x1c   : > { %222 = sbr.rel (%p389_p9) target bundleno = 35 (0x23), region = 74 }
  0x21   : > { %vm223_vm0 = vcmask 254976   ;;  %v521_v2 = vmov 0.0  }
  0x22   : > { %224 = vst.msk [vmem:[#allocation2] sm:$0x3] %vm223_vm0, %v521_v2 }
  0x23 PF: > { %v226_v3 = vld [vmem:[%s202_s4] sm:$0xff]  ;;  %v227_v4 = vld [vmem:[%s202_s4 + $0x8] sm:$0xff]  ;;  %vm228_vm1 = vcmask 261120   ;;  %vm245_vm2 = vcmask 1041409   ;;  %vm249_vm3 = vcmask 254976   ;;  %p390_p10 = scmp.ne.s32.totalorder %s511_s14, 1 }
  0x24   : > { %v229_v5 = vsel %vm228_vm1, %v226_v3, 0.0  ;;  %v236_v6 = vsel %vm228_vm1, %v227_v4, 0.0 }
  0x25   : > { %v230_v7 = vrot.slane %v229_v5, 4  ;;  %v237_v8 = vrot.slane %v236_v6, 4 }
  0x27   : > { %v231_v9 = vadd.f32 %v230_v7, %v229_v5  ;;  %v238_v10 = vadd.f32 %v237_v8, %v236_v6 }
  0x29   : > { %v232_v11 = vrot.slane %v231_v9, 2  ;;  %v239_v12 = vrot.slane %v238_v10, 2  ;;  %v225_v17 = vld [vmem:[#allocation2] sm:$0x3] }
  0x2b   : > { %v233_v13 = vadd.f32 %v232_v11, %v231_v9  ;;  %v240_v14 = vadd.f32 %v239_v12, %v238_v10 }
  0x2d   : > { %v234_v15 = vrot.slane %v233_v13, 1  ;;  %v241_v16 = vrot.slane %v240_v14, 1 }
  0x2f   : > { %v235_v18 = vadd.f32 %v234_v15, %v233_v13  ;;  %v242_v19 = vadd.f32 %v241_v16, %v240_v14 }
  0x30   : > { %254 = sbr.rel (%p390_p10) target bundleno = 454 (0x1c6), region = 78 }
  0x31   : > { %v246_v20 = vsel %vm245_vm2, %v242_v19, %v235_v18 }
  0x32   : > { %v248_v21 = vadd.f32 %v246_v20, %v225_v17 }
  0x34   : > { %250 = vst.msk [vmem:[#allocation2] sm:$0x3] %vm249_vm3, %v248_v21 }
  0x35   : > { %v259_v22 = vld [vmem:[%s631_s1 + $0x18] sm:$0xff]  ;;  %v258_v23 = vld [vmem:[%s631_s1 + $0x10] sm:$0xff]  ;;  %v257_v24 = vld [vmem:[%s631_s1 + $0x8] sm:$0xff]  ;;  %vm287_vm4 = vcmask 1041408  }
  0x36   : > { %279 = vmatpush.msra.mxu0 %v259_v22  ;;  %v256_v25 = vld [vmem:[%s631_s1] sm:$0xff] }
  0x37   : > { %v444_v27 = vld [vmem:[%s632_s2] ss:$0 sm:$0xff] }
  0x38   : > { %280 = vmatpush.msra.mxu0 %v258_v23 }
  0x3a   : > { %281 = vmatpush.msra.mxu0 %v257_v24 }
  0x3b   : > { %v255_v26 = vld [vmem:[#allocation2] sm:$0x3] }
  0x3c   : > { %282 = vmatpush.msra.mxu0 %v256_v25 }
  0x3d   : > { %391 = vmatmul.msk.f32.vlgmr.msra.gmra.mxu0 %vm228_vm1, %v255_v26 }
  0xba   : > { %v284_v28 = vpop.f32.mrf.mxu0 }
  0xbb   : > { %v285_v29 = vadd.f32 %v444_v27, %v284_v28 }
  0xbd   : > { %v288_v30 = vsel %vm287_vm4, %v285_v29, -inf }
  0xbe   : > { %289 = vmax.xlane.f32.xlu0 %v288_v30 }
 0x131   : > { %v290_v31 = vpop.xlane.xlu0 %289 }
 0x132   : > { %v291_v32 = vsub.f32 %v285_v29, %v290_v31 }
 0x134   : > { %v292_v33 = vmul.f32 1.442695, %v291_v32 }
 0x136   : > { %445 = vpow2.f32 %v292_v33 }
 0x13c   : > { %v446_v34 = vpop.eup %445 }
 0x13d   : > { %v294_v35 = vsel %vm287_vm4, %v446_v34, 0.0 }
 0x13e   : > { %295 = vadd.xlane.f32.xlu0 %v294_v35 }
 0x1b1   : > { %v296_v36 = vpop.xlane.xlu0 %295 }
 0x1b2   : > { %447 = vrcp.f32 %v296_v36  ;;  %v308_v40 = vand.u32 2147483648, %v296_v36  ;;  %v306_v42 = vand.u32 2147483647, %v296_v36  ;;  %vm302_vm6 = vweird.f32 %v296_v36 }
 0x1b4   : > { %v309_v44 = vor.u32 1.1754944e-38, %v308_v40  ;;  %vm307_vm8 = vcmp.eq.f32.partialorder %v306_v42, 8.507059e+37 }
 0x1b8   : > { %v448_v37 = vpop.eup %447 }
 0x1b9   : > { %v298_v38 = vmul.f32 %v448_v37, %v296_v36  ;;  %vm303_vm5 = vweird.f32 %v448_v37 }
 0x1ba   : > { %vm304_vm7 = vmor %vm302_vm6, %vm303_vm5 }
 0x1bb   : > { %v299_v39 = vsub.f32 1.0, %v298_v38 }
 0x1bd   : > { %v300_v41 = vmul.f32 %v448_v37, %v299_v39 }
 0x1bf   : > { %v301_v43 = vadd.f32 %v448_v37, %v300_v41 }
 0x1c1   : > { %v305_v45 = vsel %vm304_vm7, %v448_v37, %v301_v43 }
 0x1c2   : > { %v310_v46 = vsel %vm307_vm8, %v309_v44, %v305_v45 }
 0x1c3   : > { %v311_v47 = vmul.f32 %v446_v34, %v310_v46 }
 0x1c5   : > { %312 = vst [vmem:[#allocation4] sm:$0x3] %v311_v47 }
 0x1c6 PF: > { %p400_p11 = scmp.eq.s32.totalorder %s382_s17, 1  ;;  %s323_s23 = sshll.u32 %s633_s3, 4  ;;  %s324_s23 = int_to_ptr.hbm [resolvable:$true] %s323_s23 }
 0x1c7   : > { %s522_s24 = smov [#allocation4]  }
 0x1c8   : > { %s321_s25 = sshll.u32 %s522_s24, 4  ;;  %s322_s25 = int_to_ptr.vmem [resolvable:$true] %s321_s25 }
 0x1c9   : > { %397 = dma.vmem_to_hbm [thread:$0]  (%p400_p11), %s322_s25, 32, %s324_s23, [#allocation5]  }
 0x1ca   : > { %498 = dma.done.wait (%p400_p11), [#allocation5], 32  }
 0x1cb   : > { %500 = vsyncadd (%p400_p11), [#allocation5], 4294967264 }
 0x1cc PF: > { %s14_s16 = sadd.s32 1, %s519_s16   ;;  %s634_s12 = smov %s507_s13 }
 0x1cd   : > { %p11_p12 = scmp.ge.s32.totalorder %s14_s16, 4   ;;  %s635_s13 = smov %s579_s21 }
 0x1ce   : > { %s636_s14 = smov %s515_s15  ;;  %s637_s15 = smov %s639_s18 }
 0x1cf   :  { %13 = sbr.rel (!%p11_p12) target bundleno = 3 (0x3), region = 111 }
 0x1d4   :  { %337 = vsyncpa [#allocation5], 1 }
 0x1d5   :  { %339 = vsyncpa [#allocation5 + $0x1], 1 }

</bundles_post_ra>
